<compile_context>
chip_gen: v6e
topology: v6e:2x2x1
jax: 0.10.0
libtpu: 0.0.40
codegen_flags: <defaults>
</compile_context>

<pallas_src>
import jax
import jax.numpy as jnp
from jax.experimental import pallas as pl
from jax.experimental.pallas import tpu as pltpu


def _embedding_transform_kernel(x_ref, w1_ref, s1_ref, t1_ref,
                                w2_ref, s2_ref, t2_ref, o_ref):
    # Layer 1: Linear on the MXU (bf16 in, fp32 acc), BN scale/shift in fp32, ReLU.
    x = x_ref[...].astype(jnp.bfloat16)
    h = jnp.dot(x, w1_ref[...], preferred_element_type=jnp.float32)
    h = jnp.maximum(h * s1_ref[...] + t1_ref[...], 0.0)
    # Layer 2: Linear on the MXU, BN scale/shift in fp32.
    y = jnp.dot(h.astype(jnp.bfloat16), w2_ref[...],
                preferred_element_type=jnp.float32)
    o_ref[...] = (y * s2_ref[...] + t2_ref[...]).astype(o_ref.dtype)


def _round_up(n, m):
    return ((n + m - 1) // m) * m


def _pad_cast(a, shape, dtype):
    """One fused pad+cast pass; avoids any copy when shape/dtype already match."""
    if a.shape == shape:
        return a if a.dtype == dtype else a.astype(dtype)
    out = jnp.zeros(shape, dtype)
    return out.at[tuple(slice(0, d) for d in a.shape)].set(a.astype(dtype))


def embedding_transform(x, params, *, eps=1e-5, block_b=512,
                        vmem_limit_bytes=64 * 1024 * 1024,
                        out_dtype=jnp.float32):
    """x: [B, input_size] float32. Returns [B, out_size] in `out_dtype`.

    block_b / vmem_limit_bytes tuning: v5e/v6e -> block_b 512-1024,
    vmem_limit ~96-100 MiB; v7x -> block_b 256, vmem_limit <= ~56 MiB.
    Use out_dtype=jnp.bfloat16 if downstream tolerates it (halves writeback).
    """
    (w1, b1, g1, be1, rm1, rv1,
     w2, b2, g2, be2, rm2, rv2) = params

    B, in_size = x.shape
    hidden_size = w1.shape[1]
    out_size = w2.shape[1]

    # BatchNorm (eval) + Linear bias -> per-feature fp32 (scale, shift):
    #   bn(x @ W + b) = (x @ W) * s + ((b - rm) * s + be),  s = g / sqrt(rv + eps)
    # The scale is applied in fp32 *inside* the kernel (not folded into bf16 W).
    s1 = g1 / jnp.sqrt(rv1 + eps)
    t1 = (b1 - rm1) * s1 + be1
    s2 = g2 / jnp.sqrt(rv2 + eps)
    t2 = (b2 - rm2) * s2 + be2

    # Lane-dense (128) feature padding, only where actually misaligned.
    in_p = _round_up(in_size, 128)
    hid_p = _round_up(hidden_size, 128)
    out_p = _round_up(out_size, 128)

    # Batch tiling: never pad the batch; the grid covers the tail block and
    # out-of-range rows are simply never written back to the output.
    tb = min(block_b, _round_up(B, 8))
    nb = pl.cdiv(B, tb)

    # x: feed untouched (fp32, cast in-kernel) when already lane-aligned;
    # otherwise a single fused pad+cast pass to bf16.
    x_in = x if in_p == in_size else _pad_cast(x, (B, in_p), jnp.bfloat16)

    # Weights -> bf16 for the MXU (single pad+cast pass, no scale fold).
    w1_p = _pad_cast(w1, (in_p, hid_p), jnp.bfloat16)
    w2_p = _pad_cast(w2, (hid_p, out_p), jnp.bfloat16)
    # Per-feature fp32 affine vectors (tiny).
    s1_p = _pad_cast(s1.reshape(1, -1), (1, hid_p), jnp.float32)
    t1_p = _pad_cast(t1.reshape(1, -1), (1, hid_p), jnp.float32)
    s2_p = _pad_cast(s2.reshape(1, -1), (1, out_p), jnp.float32)
    t2_p = _pad_cast(t2.reshape(1, -1), (1, out_p), jnp.float32)

    flops = int(2 * B * (in_size * hidden_size + hidden_size * out_size))
    bytes_accessed = int(
        x_in.size * jnp.dtype(x_in.dtype).itemsize
        + (w1_p.size + w2_p.size) * 2
        + (s1_p.size + t1_p.size + s2_p.size + t2_p.size) * 4
        + B * out_p * jnp.dtype(out_dtype).itemsize)
    cost = pl.CostEstimate(flops=flops, transcendentals=0,
                           bytes_accessed=bytes_accessed)

    def build(single_buffer_resident):
        def resident(shape):
            # Constant index_map => never refetched across the batch grid.
            if single_buffer_resident:
                return pl.BlockSpec(shape, lambda i: (0, 0),
                                    pipeline_mode=pl.Buffered(1))
            return pl.BlockSpec(shape, lambda i: (0, 0))

        return pl.pallas_call(
            _embedding_transform_kernel,
            out_shape=jax.ShapeDtypeStruct((B, out_p), out_dtype),
            grid_spec=pltpu.PrefetchScalarGridSpec(
                num_scalar_prefetch=0,
                grid=(nb,),
                in_specs=[
                    pl.BlockSpec((tb, in_p), lambda i: (i, 0)),  # x (streamed)
                    resident((in_p, hid_p)),                     # w1
                    resident((1, hid_p)),                        # s1
                    resident((1, hid_p)),                        # t1
                    resident((hid_p, out_p)),                    # w2
                    resident((1, out_p)),                        # s2
                    resident((1, out_p)),                        # t2
                ],
                out_specs=pl.BlockSpec((tb, out_p), lambda i: (i, 0)),
            ),
            compiler_params=pltpu.CompilerParams(
                dimension_semantics=("parallel",),
                vmem_limit_bytes=vmem_limit_bytes,
            ),
            cost_estimate=cost,
        )

    args = (x_in, w1_p, s1_p, t1_p, w2_p, s2_p, t2_p)
    try:
        out_padded = build(
            single_buffer_resident=hasattr(pl, "Buffered"))(*args)
    except Exception:
        # This JAX build / interpreter rejects pipeline_mode=pl.Buffered(1):
        # fall back to default (double-buffered) resident specs.
        out_padded = build(single_buffer_resident=False)(*args)

    return out_padded if out_p == out_size else out_padded[:, :out_size]


def init_params(key, input_size, hidden_size, out_size):
    ks = jax.random.split(key, 8)
    # Linear 1
    w1 = jax.random.normal(ks[0], (input_size, hidden_size), jnp.float32) * 0.1
    b1 = jax.random.normal(ks[1], (hidden_size,), jnp.float32) * 0.1
    # BatchNorm 1 (non-trivial values to exercise the affine fold)
    g1 = 1.0 + 0.1 * jax.random.normal(ks[2], (hidden_size,), jnp.float32)
    be1 = 0.1 * jax.random.normal(ks[3], (hidden_size,), jnp.float32)
    rm1 = jnp.zeros((hidden_size,), jnp.float32)
    rv1 = jnp.ones((hidden_size,), jnp.float32)
    # Linear 2
    w2 = jax.random.normal(ks[4], (hidden_size, out_size), jnp.float32) * 0.1
    b2 = jax.random.normal(ks[5], (out_size,), jnp.float32) * 0.1
    # BatchNorm 2
    g2 = 1.0 + 0.1 * jax.random.normal(ks[6], (out_size,), jnp.float32)
    be2 = 0.1 * jax.random.normal(ks[7], (out_size,), jnp.float32)
    rm2 = jnp.zeros((out_size,), jnp.float32)
    rv2 = jnp.ones((out_size,), jnp.float32)
    return (w1, b1, g1, be1, rm1, rv1, w2, b2, g2, be2, rm2, rv2)


def reference(x, params, eps=1e-5):
    (w1, b1, g1, be1, rm1, rv1, w2, b2, g2, be2, rm2, rv2) = params
    h = x @ w1 + b1
    h = (h - rm1) / jnp.sqrt(rv1 + eps) * g1 + be1
    h = jnp.maximum(h, 0.0)
    y = h @ w2 + b2
    y = (y - rm2) / jnp.sqrt(rv2 + eps) * g2 + be2
    return y


if __name__ == "__main__":
    B, input_size, hidden_size, out_size = 8, 32, 64, 16

    key = jax.random.PRNGKey(0)
    kx, kp = jax.random.split(key)
    x = jax.random.normal(kx, (B, input_size), jnp.float32)
    params = init_params(kp, input_size, hidden_size, out_size)

    out = embedding_transform(x, params)
    out = jax.block_until_ready(out)

    ref = reference(x, params)
    assert out.shape == (B, out_size)
    # bf16 activations/weights with fp32 accumulation and fp32 BN affine ->
    # loosened tolerance vs the fp32 reference.
    assert jnp.allclose(out, ref, atol=3e-2, rtol=3e-2), "mismatch vs reference"

    print("KERNEL_OK")
</pallas_src>

<mosaic_0001>
module attributes {stable_mosaic.version = 11 : i64} {
  func.func @_embedding_transform_kernel(%arg0: i32, %arg1: memref<8x128xbf16, #tpu.memory_space<vmem>>, %arg2: memref<128x128xbf16, #tpu.memory_space<vmem>>, %arg3: memref<1x128xf32, #tpu.memory_space<vmem>>, %arg4: memref<1x128xf32, #tpu.memory_space<vmem>>, %arg5: memref<128x128xbf16, #tpu.memory_space<vmem>>, %arg6: memref<1x128xf32, #tpu.memory_space<vmem>>, %arg7: memref<1x128xf32, #tpu.memory_space<vmem>>, %arg8: memref<8x128xf32, #tpu.memory_space<vmem>>) attributes {dimension_semantics = [#tpu.dimension_semantics<parallel>], iteration_bounds = array<i64: 1>, scalar_prefetch = 0 : i64, scratch_operands = 0 : i64, tpu.core_type = #tpu.core_type<tc>, window_params = [{transform_indices = @transform_0, window_bounds = array<i64: 8, 128>}, {pipeline_mode = #tpu.pipeline_mode<synchronous>, transform_indices = @transform_1, window_bounds = array<i64: 128, 128>}, {pipeline_mode = #tpu.pipeline_mode<synchronous>, transform_indices = @transform_2, window_bounds = array<i64: 1, 128>}, {pipeline_mode = #tpu.pipeline_mode<synchronous>, transform_indices = @transform_3, window_bounds = array<i64: 1, 128>}, {pipeline_mode = #tpu.pipeline_mode<synchronous>, transform_indices = @transform_4, window_bounds = array<i64: 128, 128>}, {pipeline_mode = #tpu.pipeline_mode<synchronous>, transform_indices = @transform_5, window_bounds = array<i64: 1, 128>}, {pipeline_mode = #tpu.pipeline_mode<synchronous>, transform_indices = @transform_6, window_bounds = array<i64: 1, 128>}, {transform_indices = @transform_7, window_bounds = array<i64: 8, 128>}]} {
    %c0 = arith.constant 0 : index
    %c0_0 = arith.constant 0 : index
    %0 = vector.load %arg1[%c0, %c0_0] : memref<8x128xbf16, #tpu.memory_space<vmem>>, vector<8x128xbf16>
    %c0_1 = arith.constant 0 : index
    %c0_2 = arith.constant 0 : index
    %1 = vector.load %arg2[%c0_1, %c0_2] : memref<128x128xbf16, #tpu.memory_space<vmem>>, vector<128x128xbf16>
    %cst = arith.constant dense<0.000000e+00> : vector<8x128xf32>
    %2 = tpu.matmul %0, %1, %cst {dimension_numbers = #tpu.dot_dimension_numbers<[1], [0], [0], [1], [0, 0, 1, 1], [], []>} : vector<8x128xbf16>, vector<128x128xbf16>, vector<8x128xf32> -> vector<8x128xf32>
    %c0_3 = arith.constant 0 : index
    %c0_4 = arith.constant 0 : index
    %3 = vector.load %arg3[%c0_3, %c0_4] : memref<1x128xf32, #tpu.memory_space<vmem>>, vector<1x128xf32>
    %4 = vector.broadcast %3 : vector<1x128xf32> to vector<8x128xf32>
    %5 = arith.mulf %2, %4 : vector<8x128xf32>
    %c0_5 = arith.constant 0 : index
    %c0_6 = arith.constant 0 : index
    %6 = vector.load %arg4[%c0_5, %c0_6] : memref<1x128xf32, #tpu.memory_space<vmem>>, vector<1x128xf32>
    %7 = vector.broadcast %6 : vector<1x128xf32> to vector<8x128xf32>
    %8 = arith.addf %5, %7 : vector<8x128xf32>
    %cst_7 = arith.constant 0.000000e+00 : f32
    %9 = vector.broadcast %cst_7 : f32 to vector<8x128xf32>
    %10 = arith.maximumf %8, %9 : vector<8x128xf32>
    %11 = arith.truncf %10 : vector<8x128xf32> to vector<8x128xbf16>
    %c0_8 = arith.constant 0 : index
    %c0_9 = arith.constant 0 : index
    %12 = vector.load %arg5[%c0_8, %c0_9] : memref<128x128xbf16, #tpu.memory_space<vmem>>, vector<128x128xbf16>
    %cst_10 = arith.constant dense<0.000000e+00> : vector<8x128xf32>
    %13 = tpu.matmul %11, %12, %cst_10 {dimension_numbers = #tpu.dot_dimension_numbers<[1], [0], [0], [1], [0, 0, 1, 1], [], []>} : vector<8x128xbf16>, vector<128x128xbf16>, vector<8x128xf32> -> vector<8x128xf32>
    %c0_11 = arith.constant 0 : index
    %c0_12 = arith.constant 0 : index
    %14 = vector.load %arg6[%c0_11, %c0_12] : memref<1x128xf32, #tpu.memory_space<vmem>>, vector<1x128xf32>
    %15 = vector.broadcast %14 : vector<1x128xf32> to vector<8x128xf32>
    %16 = arith.mulf %13, %15 : vector<8x128xf32>
    %c0_13 = arith.constant 0 : index
    %c0_14 = arith.constant 0 : index
    %17 = vector.load %arg7[%c0_13, %c0_14] : memref<1x128xf32, #tpu.memory_space<vmem>>, vector<1x128xf32>
    %18 = vector.broadcast %17 : vector<1x128xf32> to vector<8x128xf32>
    %19 = arith.addf %16, %18 : vector<8x128xf32>
    %c0_15 = arith.constant 0 : index
    %c0_16 = arith.constant 0 : index
    %20 = vector.load %arg8[%c0_15, %c0_16] : memref<8x128xf32, #tpu.memory_space<vmem>>, vector<8x128xf32>
    tpu.vector_store %arg8[%c0_15, %c0_16], %19 {strides = array<i32>} : memref<8x128xf32, #tpu.memory_space<vmem>>, vector<8x128xf32>,
    return
  }
  func.func @transform_0(%arg0: i32) -> (i32, i32) {
    %c0_i32 = arith.constant 0 : i32
    %c0_i32_0 = arith.constant 0 : i32
    return %arg0, %c0_i32 : i32, i32
  }
  func.func @transform_1(%arg0: i32) -> (i32, i32) {
    %c0_i32 = arith.constant 0 : i32
    %c0_i32_0 = arith.constant 0 : i32
    %c0_i32_1 = arith.constant 0 : i32
    return %c0_i32, %c0_i32_0 : i32, i32
  }
  func.func @transform_2(%arg0: i32) -> (i32, i32) {
    %c0_i32 = arith.constant 0 : i32
    %c0_i32_0 = arith.constant 0 : i32
    %c0_i32_1 = arith.constant 0 : i32
    return %c0_i32, %c0_i32_0 : i32, i32
  }
  func.func @transform_3(%arg0: i32) -> (i32, i32) {
    %c0_i32 = arith.constant 0 : i32
    %c0_i32_0 = arith.constant 0 : i32
    %c0_i32_1 = arith.constant 0 : i32
    return %c0_i32, %c0_i32_0 : i32, i32
  }
  func.func @transform_4(%arg0: i32) -> (i32, i32) {
    %c0_i32 = arith.constant 0 : i32
    %c0_i32_0 = arith.constant 0 : i32
    %c0_i32_1 = arith.constant 0 : i32
    return %c0_i32, %c0_i32_0 : i32, i32
  }
  func.func @transform_5(%arg0: i32) -> (i32, i32) {
    %c0_i32 = arith.constant 0 : i32
    %c0_i32_0 = arith.constant 0 : i32
    %c0_i32_1 = arith.constant 0 : i32
    return %c0_i32, %c0_i32_0 : i32, i32
  }
  func.func @transform_6(%arg0: i32) -> (i32, i32) {
    %c0_i32 = arith.constant 0 : i32
    %c0_i32_0 = arith.constant 0 : i32
    %c0_i32_1 = arith.constant 0 : i32
    return %c0_i32, %c0_i32_0 : i32, i32
  }
  func.func @transform_7(%arg0: i32) -> (i32, i32) {
    %c0_i32 = arith.constant 0 : i32
    %c0_i32_0 = arith.constant 0 : i32
    return %arg0, %c0_i32 : i32, i32
  }
}

module attributes {stable_mosaic.version = 11 : i64} {
  func.func @_embedding_transform_kernel(%arg0: i32, %arg1: memref<8x128xbf16, #tpu.memory_space<vmem>>, %arg2: memref<128x128xbf16, #tpu.memory_space<vmem>>, %arg3: memref<1x128xf32, #tpu.memory_space<vmem>>, %arg4: memref<1x128xf32, #tpu.memory_space<vmem>>, %arg5: memref<128x128xbf16, #tpu.memory_space<vmem>>, %arg6: memref<1x128xf32, #tpu.memory_space<vmem>>, %arg7: memref<1x128xf32, #tpu.memory_space<vmem>>, %arg8: memref<8x128xf32, #tpu.memory_space<vmem>>) attributes {dimension_semantics = [#tpu.dimension_semantics<parallel>], iteration_bounds = array<i64: 1>, scalar_prefetch = 0 : i64, scratch_operands = 0 : i64, tpu.core_type = #tpu.core_type<tc>, window_params = [{transform_indices = @transform_0, window_bounds = array<i64: 8, 128>}, {pipeline_mode = #tpu.pipeline_mode<synchronous>, transform_indices = @transform_1, window_bounds = array<i64: 128, 128>}, {pipeline_mode = #tpu.pipeline_mode<synchronous>, transform_indices = @transform_2, window_bounds = array<i64: 1, 128>}, {pipeline_mode = #tpu.pipeline_mode<synchronous>, transform_indices = @transform_3, window_bounds = array<i64: 1, 128>}, {pipeline_mode = #tpu.pipeline_mode<synchronous>, transform_indices = @transform_4, window_bounds = array<i64: 128, 128>}, {pipeline_mode = #tpu.pipeline_mode<synchronous>, transform_indices = @transform_5, window_bounds = array<i64: 1, 128>}, {pipeline_mode = #tpu.pipeline_mode<synchronous>, transform_indices = @transform_6, window_bounds = array<i64: 1, 128>}, {transform_indices = @transform_7, window_bounds = array<i64: 8, 128>}]} {
    %c0 = arith.constant 0 : index
    %c0_0 = arith.constant 0 : index
    %0 = vector.load %arg1[%c0, %c0_0] : memref<8x128xbf16, #tpu.memory_space<vmem>>, vector<8x128xbf16>
    %c0_1 = arith.constant 0 : index
    %c0_2 = arith.constant 0 : index
    %1 = vector.load %arg2[%c0_1, %c0_2] : memref<128x128xbf16, #tpu.memory_space<vmem>>, vector<128x128xbf16>
    %cst = arith.constant dense<0.000000e+00> : vector<8x128xf32>
    %2 = tpu.matmul %0, %1, %cst {dimension_numbers = #tpu.dot_dimension_numbers<[1], [0], [0], [1], [0, 0, 1, 1], [], []>} : vector<8x128xbf16>, vector<128x128xbf16>, vector<8x128xf32> -> vector<8x128xf32>
    %c0_3 = arith.constant 0 : index
    %c0_4 = arith.constant 0 : index
    %3 = vector.load %arg3[%c0_3, %c0_4] : memref<1x128xf32, #tpu.memory_space<vmem>>, vector<1x128xf32>
    %4 = vector.broadcast %3 : vector<1x128xf32> to vector<8x128xf32>
    %5 = arith.mulf %2, %4 : vector<8x128xf32>
    %c0_5 = arith.constant 0 : index
    %c0_6 = arith.constant 0 : index
    %6 = vector.load %arg4[%c0_5, %c0_6] : memref<1x128xf32, #tpu.memory_space<vmem>>, vector<1x128xf32>
    %7 = vector.broadcast %6 : vector<1x128xf32> to vector<8x128xf32>
    %8 = arith.addf %5, %7 : vector<8x128xf32>
    %cst_7 = arith.constant 0.000000e+00 : f32
    %9 = vector.broadcast %cst_7 : f32 to vector<8x128xf32>
    %10 = arith.maximumf %8, %9 : vector<8x128xf32>
    %11 = arith.truncf %10 : vector<8x128xf32> to vector<8x128xbf16>
    %c0_8 = arith.constant 0 : index
    %c0_9 = arith.constant 0 : index
    %12 = vector.load %arg5[%c0_8, %c0_9] : memref<128x128xbf16, #tpu.memory_space<vmem>>, vector<128x128xbf16>
    %cst_10 = arith.constant dense<0.000000e+00> : vector<8x128xf32>
    %13 = tpu.matmul %11, %12, %cst_10 {dimension_numbers = #tpu.dot_dimension_numbers<[1], [0], [0], [1], [0, 0, 1, 1], [], []>} : vector<8x128xbf16>, vector<128x128xbf16>, vector<8x128xf32> -> vector<8x128xf32>
    %c0_11 = arith.constant 0 : index
    %c0_12 = arith.constant 0 : index
    %14 = vector.load %arg6[%c0_11, %c0_12] : memref<1x128xf32, #tpu.memory_space<vmem>>, vector<1x128xf32>
    %15 = vector.broadcast %14 : vector<1x128xf32> to vector<8x128xf32>
    %16 = arith.mulf %13, %15 : vector<8x128xf32>
    %c0_13 = arith.constant 0 : index
    %c0_14 = arith.constant 0 : index
    %17 = vector.load %arg7[%c0_13, %c0_14] : memref<1x128xf32, #tpu.memory_space<vmem>>, vector<1x128xf32>
    %18 = vector.broadcast %17 : vector<1x128xf32> to vector<8x128xf32>
    %19 = arith.addf %16, %18 : vector<8x128xf32>
    %c0_15 = arith.constant 0 : index
    %c0_16 = arith.constant 0 : index
    %20 = vector.load %arg8[%c0_15, %c0_16] : memref<8x128xf32, #tpu.memory_space<vmem>>, vector<8x128xf32>
    tpu.vector_store %arg8[%c0_15, %c0_16], %19 {strides = array<i32>} : memref<8x128xf32, #tpu.memory_space<vmem>>, vector<8x128xf32>,
    return
  }
  func.func @transform_0(%arg0: i32) -> (i32, i32) {
    %c0_i32 = arith.constant 0 : i32
    %c0_i32_0 = arith.constant 0 : i32
    return %arg0, %c0_i32 : i32, i32
  }
  func.func @transform_1(%arg0: i32) -> (i32, i32) {
    %c0_i32 = arith.constant 0 : i32
    %c0_i32_0 = arith.constant 0 : i32
    %c0_i32_1 = arith.constant 0 : i32
    return %c0_i32, %c0_i32_0 : i32, i32
  }
  func.func @transform_2(%arg0: i32) -> (i32, i32) {
    %c0_i32 = arith.constant 0 : i32
    %c0_i32_0 = arith.constant 0 : i32
    %c0_i32_1 = arith.constant 0 : i32
    return %c0_i32, %c0_i32_0 : i32, i32
  }
  func.func @transform_3(%arg0: i32) -> (i32, i32) {
    %c0_i32 = arith.constant 0 : i32
    %c0_i32_0 = arith.constant 0 : i32
    %c0_i32_1 = arith.constant 0 : i32
    return %c0_i32, %c0_i32_0 : i32, i32
  }
  func.func @transform_4(%arg0: i32) -> (i32, i32) {
    %c0_i32 = arith.constant 0 : i32
    %c0_i32_0 = arith.constant 0 : i32
    %c0_i32_1 = arith.constant 0 : i32
    return %c0_i32, %c0_i32_0 : i32, i32
  }
  func.func @transform_5(%arg0: i32) -> (i32, i32) {
    %c0_i32 = arith.constant 0 : i32
    %c0_i32_0 = arith.constant 0 : i32
    %c0_i32_1 = arith.constant 0 : i32
    return %c0_i32, %c0_i32_0 : i32, i32
  }
  func.func @transform_6(%arg0: i32) -> (i32, i32) {
    %c0_i32 = arith.constant 0 : i32
    %c0_i32_0 = arith.constant 0 : i32
    %c0_i32_1 = arith.constant 0 : i32
    return %c0_i32, %c0_i32_0 : i32, i32
  }
  func.func @transform_7(%arg0: i32) -> (i32, i32) {
    %c0_i32 = arith.constant 0 : i32
    %c0_i32_0 = arith.constant 0 : i32
    return %arg0, %c0_i32 : i32, i32
  }
}

</mosaic_0001>

<bundles_post_ra>
// kernel: tpu_custom_call.1
= control target key start
LH: loop header
LB: loop body
LE: loop exit
PB: predicated region body
PF: predicated region fallthrough
CT: control target
= control target key end

     0   :  { %12 = vsyncpa [#allocation3], 0  ;;  %s587_s0 = inlined_call_operand.hbm [shape: bf16[8,128], index: 0, kind: input, shape index: {}]   ;;  %s588_s1 = inlined_call_operand.hbm [shape: bf16[128,128], index: 1, kind: input, shape index: {}]   ;;  %s589_s2 = inlined_call_operand.vmem [shape: f32[1,128], index: 2, kind: input, shape index: {}]   ;;  %s590_s3 = inlined_call_operand.vmem [shape: f32[1,128], index: 3, kind: input, shape index: {}]   ;;  %s591_s4 = inlined_call_operand.hbm [shape: bf16[128,128], index: 4, kind: input, shape index: {}]   ;;  %s592_s5 = inlined_call_operand.vmem [shape: f32[1,128], index: 5, kind: input, shape index: {}]   ;;  %s593_s6 = inlined_call_operand.vmem [shape: f32[1,128], index: 6, kind: input, shape index: {}]   ;;  %s594_s7 = inlined_call_operand.hbm [shape: f32[8,128], index: 7, kind: output, shape index: {}]  }
   0x1   :  { %13 = vsyncpa [#allocation6], 0 }
   0x2   :  { %14 = vsyncpa [#allocation4], 0  ;;  %s515_s24 = smov [#allocation5]  }
   0x3   :  { %s30_s25 = sshll.u32 %s515_s24, 4  ;;  %s31_s25 = int_to_ptr.vmem [resolvable:$true] %s30_s25 }
   0x4   :  { %s437_s26 = scalar_lea.vmem %s31_s25, 1024  ;;  %p442_p1 = scmp.lt.s32.totalorder %s31_s25, %s31_s25 }
   0x5   :  { %p438_p0 = scmp.ne.s32.totalorder %s31_s25, %s437_s26  ;;  %p443_p2 = scmp.lt.s32.totalorder %s437_s26, %s437_s26 }
   0x7   :  { %p444_p3 = por %p443_p2, %p442_p1 }
   0x9   :  { %p445_p4 = pnand %p444_p3, %p438_p0 }
   0xb   :  { %448 = shalt.err (!%p445_p4)
}
   0xc   :  { %s516_s27 = smov 64   ;;  %s517_s28 = smov 4  }
   0xd   :  { %36 = dma.hbm_to_vmem [thread:$0]  %s588_s1, 1024, %s31_s25, [#allocation6], %s516_s27, %s516_s27, %s517_s28  }
   0xe   :  { %s518_s8 = smov [#allocation2]   ;;  %s519_s10 = smov [#allocation7]  }
   0xf   :  { %s21_s9 = sshll.u32 %s518_s8, 4  ;;  %s46_s11 = sshll.u32 %s519_s10, 4  ;;  %s22_s9 = int_to_ptr.vmem [resolvable:$true] %s21_s9  ;;  %s47_s11 = int_to_ptr.vmem [resolvable:$true] %s46_s11 }
  0x10   :  { %s457_s12 = scalar_lea.vmem %s22_s9, 64  ;;  %p462_p6 = scmp.lt.s32.totalorder %s22_s9, %s22_s9 }
  0x11   :  { %p458_p5 = scmp.ne.s32.totalorder %s22_s9, %s457_s12  ;;  %p463_p7 = scmp.lt.s32.totalorder %s457_s12, %s457_s12 }
  0x13   :  { %p464_p8 = por %p463_p7, %p462_p6 }
  0x15   :  { %p465_p9 = pnand %p464_p8, %p458_p5 }
  0x17   :  { %468 = shalt.err (!%p465_p9)
}
  0x18   :  { %24 = dma.hbm_to_vmem [thread:$0]  %s587_s0, 64, %s22_s9, [#allocation3]  }
  0x19   :  { %s477_s15 = scalar_lea.vmem %s47_s11, 1024  ;;  %p482_p11 = scmp.lt.s32.totalorder %s47_s11, %s47_s11 }
  0x1a   :  { %p478_p10 = scmp.ne.s32.totalorder %s47_s11, %s477_s15  ;;  %p483_p12 = scmp.lt.s32.totalorder %s477_s15, %s477_s15 }
  0x1c   :  { %p484_p13 = por %p483_p12, %p482_p11 }
  0x1e   :  { %p485_p0 = pnand %p484_p13, %p478_p10 }
  0x20   :  { %488 = shalt.err (!%p485_p0)
}
  0x21   :  { %52 = dma.hbm_to_vmem [thread:$0]  %s591_s4, 1024, %s47_s11, [#allocation6], %s516_s27, %s516_s27, %s517_s28  }
  0x22   :  { %509 = dma.done.wait [#allocation3], 64  }
  0x23   :  { %510 = vsyncadd [#allocation3], 4294967232 }
  0x24   :  { %511 = dma.done.wait [#allocation6], 2048  }
  0x25   :  { %512 = vsyncadd [#allocation6], 4294965248  ;;  %v520_v0 = vmov 0.0   ;;  %vm521_vm0 = vmmov 0   ;;  %v413_v1 = vld [vmem:[#allocation5 + $0x38] sm:$0xff]   ;;  %v414_v2 = vld [vmem:[#allocation5 + $0x30] sm:$0xff]  }
  0x26   :  { %365 = vmatprep.subr.bf16.mxu0 %v520_v0  ;;  %381 = vmatprep.mubr.msk.bf16.mxu0 %vm521_vm0, %v520_v0  ;;  %v415_v3 = vld [vmem:[#allocation5 + $0x28] sm:$0xff]   ;;  %v421_v4 = vld [vmem:[#allocation7 + $0x38] sm:$0xff]   ;;  %v416_v5 = vld [vmem:[#allocation5 + $0x20] sm:$0xff]   ;;  %s522_s22 = smov [#allocation8]  }
  0x27   :  { %385 = vmatprep.subr.bf16.mxu1 %v520_v0  ;;  %401 = vmatprep.mubr.msk.bf16.mxu1 %vm521_vm0, %v520_v0  ;;  %v422_v6 = vld [vmem:[#allocation7 + $0x30] sm:$0xff]   ;;  %v417_v7 = vld [vmem:[#allocation5 + $0x18] sm:$0xff]   ;;  %v423_v8 = vld [vmem:[#allocation7 + $0x28] sm:$0xff]   ;;  %s317_s23 = sshll.u32 %s522_s22, 4  ;;  %s318_s23 = int_to_ptr.vmem [resolvable:$true] %s317_s23 }
  0x28   :  { %366 = vmatpush3.bf16.msra.mxu0 %v413_v1  ;;  %386 = vmatpush3.bf16.msra.mxu1 %v421_v4  ;;  %v418_v9 = vld [vmem:[#allocation5 + $0x10] sm:$0xff]   ;;  %v424_v10 = vld [vmem:[#allocation7 + $0x20] sm:$0xff]   ;;  %v419_v11 = vld [vmem:[#allocation5 + $0x8] sm:$0xff]   ;;  %p494_p2 = scmp.lt.s32.totalorder %s318_s23, %s318_s23 }
  0x29   :  { %367 = vmatprep.subr.bf16.mxu0 %v520_v0  ;;  %387 = vmatprep.subr.bf16.mxu1 %v520_v0  ;;  %v425_v12 = vld [vmem:[#allocation7 + $0x18] sm:$0xff]   ;;  %v420_v13 = vld [vmem:[#allocation5] sm:$0xff]   ;;  %v426_v14 = vld [vmem:[#allocation7 + $0x10] sm:$0xff]  }
  0x2a   :  { %v67_v15 = vld [vmem:[#allocation2] sm:$0xf]  ;;  %v427_v16 = vld [vmem:[#allocation7 + $0x8] sm:$0xff]   ;;  %v428_v17 = vld [vmem:[#allocation7] sm:$0xff]  }
  0x2b   :  { %v335_v18 = vld [vmem:[%s589_s2] ss:$0 sm:$0xff] }
  0x2c   :  { %368 = vmatpush3.bf16.msra.mxu0 %v414_v2  ;;  %388 = vmatpush3.bf16.msra.mxu1 %v422_v6  ;;  %v336_v20 = vld [vmem:[%s590_s3] ss:$0 sm:$0xff]  ;;  %s489_s3 = scalar_lea.vmem %s318_s23, 128 }
  0x2d   :  { %369 = vmatprep.subr.bf16.mxu0 %v520_v0  ;;  %389 = vmatprep.subr.bf16.mxu1 %v520_v0  ;;  %v345_v28 = vld [vmem:[%s592_s5] ss:$0 sm:$0xff]  ;;  %p490_p1 = scmp.ne.s32.totalorder %s318_s23, %s489_s3  ;;  %p495_p3 = scmp.lt.s32.totalorder %s489_s3, %s489_s3 }
  0x2e   :  { %v346_v30 = vld [vmem:[%s593_s6] ss:$0 sm:$0xff] }
  0x2f   :  { %p496_p4 = por %p495_p3, %p494_p2 }
  0x30   :  { %370 = vmatpush3.bf16.msra.mxu0 %v415_v3  ;;  %390 = vmatpush3.bf16.msra.mxu1 %v423_v8 }
  0x31   :  { %371 = vmatprep.subr.bf16.mxu0 %v520_v0  ;;  %391 = vmatprep.subr.bf16.mxu1 %v520_v0  ;;  %p497_p5 = pnand %p496_p4, %p490_p1 }
  0x34   :  { %372 = vmatpush3.bf16.msra.mxu0 %v416_v5  ;;  %392 = vmatpush3.bf16.msra.mxu1 %v424_v10 }
  0x35   :  { %373 = vmatprep.subr.bf16.mxu0 %v520_v0  ;;  %393 = vmatprep.subr.bf16.mxu1 %v520_v0 }
  0x38   :  { %374 = vmatpush3.bf16.msra.mxu0 %v417_v7  ;;  %394 = vmatpush3.bf16.msra.mxu1 %v425_v12 }
  0x39   :  { %375 = vmatprep.subr.bf16.mxu0 %v520_v0  ;;  %395 = vmatprep.subr.bf16.mxu1 %v520_v0 }
  0x3c   :  { %376 = vmatpush3.bf16.msra.mxu0 %v418_v9  ;;  %396 = vmatpush3.bf16.msra.mxu1 %v426_v14 }
  0x3d   :  { %377 = vmatprep.subr.bf16.mxu0 %v520_v0  ;;  %397 = vmatprep.subr.bf16.mxu1 %v520_v0 }
  0x40   :  { %378 = vmatpush3.bf16.msra.mxu0 %v419_v11  ;;  %398 = vmatpush3.bf16.msra.mxu1 %v427_v16 }
  0x41   :  { %379 = vmatprep.subr.bf16.mxu0 %v520_v0  ;;  %399 = vmatprep.subr.bf16.mxu1 %v520_v0 }
  0x44   :  { %380 = vmatpush3.bf16.msra.mxu0 %v420_v13  ;;  %400 = vmatpush3.bf16.msra.mxu1 %v428_v17 }
  0x47   :  { %382 = vmatmul.mubr.bf16.vlgmr.msra.gmra.mxu0 %v67_v15 }
 0x107   :  { %v166_v19 = vpop.f32.mrf.mxu0 }
 0x108   :  { %v179_v21 = vmul.f32 %v335_v18, %v166_v19 }
 0x109   :  { %v383_v22 = vpop.f32.mrf.mxu0 }
 0x10a   :  { %v187_v23 = vadd.f32 %v336_v20, %v179_v21 }
 0x10b   :  { %v169_v24 = vpop.f32.mrf.mxu0 }
 0x10c   :  { %v188_v25 = vmax.f32 %v187_v23, 0.0 }
 0x10d   :  { %v384_v26 = vpop.f32.mrf.mxu0 }
 0x10e   :  { %v189_v27 = vpack.c.bf16 %v188_v25, %v188_v25 }
 0x110   :  { %402 = vmatmul.mubr.bf16.vlgmr.msra.gmra.mxu1 %v189_v27 }
 0x1d0   :  { %v288_v29 = vpop.f32.mrf.mxu1 }
 0x1d1   :  { %v301_v31 = vmul.f32 %v345_v28, %v288_v29 }
 0x1d2   :  { %v403_v32 = vpop.f32.mrf.mxu1 }
 0x1d3   :  { %v309_v33 = vadd.f32 %v346_v30, %v301_v31 }
 0x1d4   :  { %v291_v34 = vpop.f32.mrf.mxu1 }
 0x1d5   :  { %310 = vst [vmem:[#allocation8] sm:$0xff] %v309_v33 }
 0x1d6   :  { %v404_v35 = vpop.f32.mrf.mxu1 }
 0x1d7   :  { %500 = shalt.err (!%p497_p5)
}
 0x1d8   :  { %320 = dma.vmem_to_hbm [thread:$0]  %s318_s23, 128, %s594_s7, [#allocation4]  }
 0x1d9   :  { %513 = dma.done.wait [#allocation4], 128  }
 0x1da   :  { %514 = vsyncadd [#allocation4], 4294967168 }
 0x1db   :  { %324 = vsyncpa [#allocation3], 1 }
 0x1dc   :  { %325 = vsyncpa [#allocation6], 1 }
 0x1dd   :  { %326 = vsyncpa [#allocation4], 1 }

// kernel: tpu_custom_call.1
= control target key start
LH: loop header
LB: loop body
LE: loop exit
PB: predicated region body
PF: predicated region fallthrough
CT: control target
= control target key end

     0   :  { %12 = vsyncpa [#allocation3], 0  ;;  %s587_s0 = inlined_call_operand.hbm [shape: bf16[8,128], index: 0, kind: input, shape index: {}]   ;;  %s588_s1 = inlined_call_operand.hbm [shape: bf16[128,128], index: 1, kind: input, shape index: {}]   ;;  %s589_s2 = inlined_call_operand.vmem [shape: f32[1,128], index: 2, kind: input, shape index: {}]   ;;  %s590_s3 = inlined_call_operand.vmem [shape: f32[1,128], index: 3, kind: input, shape index: {}]   ;;  %s591_s4 = inlined_call_operand.hbm [shape: bf16[128,128], index: 4, kind: input, shape index: {}]   ;;  %s592_s5 = inlined_call_operand.vmem [shape: f32[1,128], index: 5, kind: input, shape index: {}]   ;;  %s593_s6 = inlined_call_operand.vmem [shape: f32[1,128], index: 6, kind: input, shape index: {}]   ;;  %s594_s7 = inlined_call_operand.hbm [shape: f32[8,128], index: 7, kind: output, shape index: {}]  }
   0x1   :  { %13 = vsyncpa [#allocation6], 0 }
   0x2   :  { %14 = vsyncpa [#allocation4], 0  ;;  %s515_s24 = smov [#allocation5]  }
   0x3   :  { %s30_s25 = sshll.u32 %s515_s24, 4  ;;  %s31_s25 = int_to_ptr.vmem [resolvable:$true] %s30_s25 }
   0x4   :  { %s437_s26 = scalar_lea.vmem %s31_s25, 1024  ;;  %p442_p1 = scmp.lt.s32.totalorder %s31_s25, %s31_s25 }
   0x5   :  { %p438_p0 = scmp.ne.s32.totalorder %s31_s25, %s437_s26  ;;  %p443_p2 = scmp.lt.s32.totalorder %s437_s26, %s437_s26 }
   0x7   :  { %p444_p3 = por %p443_p2, %p442_p1 }
   0x9   :  { %p445_p4 = pnand %p444_p3, %p438_p0 }
   0xb   :  { %448 = shalt.err (!%p445_p4)
}
   0xc   :  { %s516_s27 = smov 64   ;;  %s517_s28 = smov 4  }
   0xd   :  { %36 = dma.hbm_to_vmem [thread:$0]  %s588_s1, 1024, %s31_s25, [#allocation6], %s516_s27, %s516_s27, %s517_s28  }
   0xe   :  { %s518_s8 = smov [#allocation2]   ;;  %s519_s10 = smov [#allocation7]  }
   0xf   :  { %s21_s9 = sshll.u32 %s518_s8, 4  ;;  %s46_s11 = sshll.u32 %s519_s10, 4  ;;  %s22_s9 = int_to_ptr.vmem [resolvable:$true] %s21_s9  ;;  %s47_s11 = int_to_ptr.vmem [resolvable:$true] %s46_s11 }
  0x10   :  { %s457_s12 = scalar_lea.vmem %s22_s9, 64  ;;  %p462_p6 = scmp.lt.s32.totalorder %s22_s9, %s22_s9 }
  0x11   :  { %p458_p5 = scmp.ne.s32.totalorder %s22_s9, %s457_s12  ;;  %p463_p7 = scmp.lt.s32.totalorder %s457_s12, %s457_s12 }
  0x13   :  { %p464_p8 = por %p463_p7, %p462_p6 }
  0x15   :  { %p465_p9 = pnand %p464_p8, %p458_p5 }
  0x17   :  { %468 = shalt.err (!%p465_p9)
}
  0x18   :  { %24 = dma.hbm_to_vmem [thread:$0]  %s587_s0, 64, %s22_s9, [#allocation3]  }
  0x19   :  { %s477_s15 = scalar_lea.vmem %s47_s11, 1024  ;;  %p482_p11 = scmp.lt.s32.totalorder %s47_s11, %s47_s11 }
  0x1a   :  { %p478_p10 = scmp.ne.s32.totalorder %s47_s11, %s477_s15  ;;  %p483_p12 = scmp.lt.s32.totalorder %s477_s15, %s477_s15 }
  0x1c   :  { %p484_p13 = por %p483_p12, %p482_p11 }
  0x1e   :  { %p485_p0 = pnand %p484_p13, %p478_p10 }
  0x20   :  { %488 = shalt.err (!%p485_p0)
}
  0x21   :  { %52 = dma.hbm_to_vmem [thread:$0]  %s591_s4, 1024, %s47_s11, [#allocation6], %s516_s27, %s516_s27, %s517_s28  }
  0x22   :  { %509 = dma.done.wait [#allocation3], 64  }
  0x23   :  { %510 = vsyncadd [#allocation3], 4294967232 }
  0x24   :  { %511 = dma.done.wait [#allocation6], 2048  }
  0x25   :  { %512 = vsyncadd [#allocation6], 4294965248  ;;  %v520_v0 = vmov 0.0   ;;  %vm521_vm0 = vmmov 0   ;;  %v413_v1 = vld [vmem:[#allocation5 + $0x38] sm:$0xff]   ;;  %v414_v2 = vld [vmem:[#allocation5 + $0x30] sm:$0xff]  }
  0x26   :  { %365 = vmatprep.subr.bf16.mxu0 %v520_v0  ;;  %381 = vmatprep.mubr.msk.bf16.mxu0 %vm521_vm0, %v520_v0  ;;  %v415_v3 = vld [vmem:[#allocation5 + $0x28] sm:$0xff]   ;;  %v421_v4 = vld [vmem:[#allocation7 + $0x38] sm:$0xff]   ;;  %v416_v5 = vld [vmem:[#allocation5 + $0x20] sm:$0xff]   ;;  %s522_s22 = smov [#allocation8]  }
  0x27   :  { %385 = vmatprep.subr.bf16.mxu1 %v520_v0  ;;  %401 = vmatprep.mubr.msk.bf16.mxu1 %vm521_vm0, %v520_v0  ;;  %v422_v6 = vld [vmem:[#allocation7 + $0x30] sm:$0xff]   ;;  %v417_v7 = vld [vmem:[#allocation5 + $0x18] sm:$0xff]   ;;  %v423_v8 = vld [vmem:[#allocation7 + $0x28] sm:$0xff]   ;;  %s317_s23 = sshll.u32 %s522_s22, 4  ;;  %s318_s23 = int_to_ptr.vmem [resolvable:$true] %s317_s23 }
  0x28   :  { %366 = vmatpush3.bf16.msra.mxu0 %v413_v1  ;;  %386 = vmatpush3.bf16.msra.mxu1 %v421_v4  ;;  %v418_v9 = vld [vmem:[#allocation5 + $0x10] sm:$0xff]   ;;  %v424_v10 = vld [vmem:[#allocation7 + $0x20] sm:$0xff]   ;;  %v419_v11 = vld [vmem:[#allocation5 + $0x8] sm:$0xff]   ;;  %p494_p2 = scmp.lt.s32.totalorder %s318_s23, %s318_s23 }
  0x29   :  { %367 = vmatprep.subr.bf16.mxu0 %v520_v0  ;;  %387 = vmatprep.subr.bf16.mxu1 %v520_v0  ;;  %v425_v12 = vld [vmem:[#allocation7 + $0x18] sm:$0xff]   ;;  %v420_v13 = vld [vmem:[#allocation5] sm:$0xff]   ;;  %v426_v14 = vld [vmem:[#allocation7 + $0x10] sm:$0xff]  }
  0x2a   :  { %v67_v15 = vld [vmem:[#allocation2] sm:$0xf]  ;;  %v427_v16 = vld [vmem:[#allocation7 + $0x8] sm:$0xff]   ;;  %v428_v17 = vld [vmem:[#allocation7] sm:$0xff]  }
  0x2b   :  { %v335_v18 = vld [vmem:[%s589_s2] ss:$0 sm:$0xff] }
  0x2c   :  { %368 = vmatpush3.bf16.msra.mxu0 %v414_v2  ;;  %388 = vmatpush3.bf16.msra.mxu1 %v422_v6  ;;  %v336_v20 = vld [vmem:[%s590_s3] ss:$0 sm:$0xff]  ;;  %s489_s3 = scalar_lea.vmem %s318_s23, 128 }
  0x2d   :  { %369 = vmatprep.subr.bf16.mxu0 %v520_v0  ;;  %389 = vmatprep.subr.bf16.mxu1 %v520_v0  ;;  %v345_v28 = vld [vmem:[%s592_s5] ss:$0 sm:$0xff]  ;;  %p490_p1 = scmp.ne.s32.totalorder %s318_s23, %s489_s3  ;;  %p495_p3 = scmp.lt.s32.totalorder %s489_s3, %s489_s3 }
  0x2e   :  { %v346_v30 = vld [vmem:[%s593_s6] ss:$0 sm:$0xff] }
  0x2f   :  { %p496_p4 = por %p495_p3, %p494_p2 }
  0x30   :  { %370 = vmatpush3.bf16.msra.mxu0 %v415_v3  ;;  %390 = vmatpush3.bf16.msra.mxu1 %v423_v8 }
  0x31   :  { %371 = vmatprep.subr.bf16.mxu0 %v520_v0  ;;  %391 = vmatprep.subr.bf16.mxu1 %v520_v0  ;;  %p497_p5 = pnand %p496_p4, %p490_p1 }
  0x34   :  { %372 = vmatpush3.bf16.msra.mxu0 %v416_v5  ;;  %392 = vmatpush3.bf16.msra.mxu1 %v424_v10 }
  0x35   :  { %373 = vmatprep.subr.bf16.mxu0 %v520_v0  ;;  %393 = vmatprep.subr.bf16.mxu1 %v520_v0 }
  0x38   :  { %374 = vmatpush3.bf16.msra.mxu0 %v417_v7  ;;  %394 = vmatpush3.bf16.msra.mxu1 %v425_v12 }
  0x39   :  { %375 = vmatprep.subr.bf16.mxu0 %v520_v0  ;;  %395 = vmatprep.subr.bf16.mxu1 %v520_v0 }
  0x3c   :  { %376 = vmatpush3.bf16.msra.mxu0 %v418_v9  ;;  %396 = vmatpush3.bf16.msra.mxu1 %v426_v14 }
  0x3d   :  { %377 = vmatprep.subr.bf16.mxu0 %v520_v0  ;;  %397 = vmatprep.subr.bf16.mxu1 %v520_v0 }
  0x40   :  { %378 = vmatpush3.bf16.msra.mxu0 %v419_v11  ;;  %398 = vmatpush3.bf16.msra.mxu1 %v427_v16 }
  0x41   :  { %379 = vmatprep.subr.bf16.mxu0 %v520_v0  ;;  %399 = vmatprep.subr.bf16.mxu1 %v520_v0 }
  0x44   :  { %380 = vmatpush3.bf16.msra.mxu0 %v420_v13  ;;  %400 = vmatpush3.bf16.msra.mxu1 %v428_v17 }
  0x47   :  { %382 = vmatmul.mubr.bf16.vlgmr.msra.gmra.mxu0 %v67_v15 }
 0x107   :  { %v166_v19 = vpop.f32.mrf.mxu0 }
 0x108   :  { %v179_v21 = vmul.f32 %v335_v18, %v166_v19 }
 0x109   :  { %v383_v22 = vpop.f32.mrf.mxu0 }
 0x10a   :  { %v187_v23 = vadd.f32 %v336_v20, %v179_v21 }
 0x10b   :  { %v169_v24 = vpop.f32.mrf.mxu0 }
 0x10c   :  { %v188_v25 = vmax.f32 %v187_v23, 0.0 }
 0x10d   :  { %v384_v26 = vpop.f32.mrf.mxu0 }
 0x10e   :  { %v189_v27 = vpack.c.bf16 %v188_v25, %v188_v25 }
 0x110   :  { %402 = vmatmul.mubr.bf16.vlgmr.msra.gmra.mxu1 %v189_v27 }
 0x1d0   :  { %v288_v29 = vpop.f32.mrf.mxu1 }
 0x1d1   :  { %v301_v31 = vmul.f32 %v345_v28, %v288_v29 }
 0x1d2   :  { %v403_v32 = vpop.f32.mrf.mxu1 }
 0x1d3   :  { %v309_v33 = vadd.f32 %v346_v30, %v301_v31 }
 0x1d4   :  { %v291_v34 = vpop.f32.mrf.mxu1 }
 0x1d5   :  { %310 = vst [vmem:[#allocation8] sm:$0xff] %v309_v33 }
 0x1d6   :  { %v404_v35 = vpop.f32.mrf.mxu1 }
 0x1d7   :  { %500 = shalt.err (!%p497_p5)
}
 0x1d8   :  { %320 = dma.vmem_to_hbm [thread:$0]  %s318_s23, 128, %s594_s7, [#allocation4]  }
 0x1d9   :  { %513 = dma.done.wait [#allocation4], 128  }
 0x1da   :  { %514 = vsyncadd [#allocation4], 4294967168 }
 0x1db   :  { %324 = vsyncpa [#allocation3], 1 }
 0x1dc   :  { %325 = vsyncpa [#allocation6], 1 }
 0x1dd   :  { %326 = vsyncpa [#allocation4], 1 }

</bundles_post_ra>
